<compile_context>
chip_gen: v5e
topology: v5e:2x2
jax: 0.10.0
libtpu: 0.0.40
codegen_flags: <defaults>
</compile_context>

<pallas_src>
import functools

import jax
import jax.numpy as jnp
from jax.experimental import pallas as pl
from jax.experimental.pallas import tpu as pltpu

_LANE = 128
_SUBLANE = 8
_NEG_INF = -1e30  # finite "minus infinity": keeps max/exp free of inf-inf NaNs


def _infonce_kernel(f_row_ref, f_colT_ref, part_ref, m_ref, l_ref, *,
                    inv_tau, n, tm, tn, fold_scale, bounded_logits,
                    mxu_dtype, mask_rows, mask_cols):
    i = pl.program_id(0)                 # row-block index  ("parallel")
    j = pl.program_id(1)                 # column-block index ("arbitrary")
    n_col_blocks = pl.num_programs(1)

    @pl.when(j == 0)
    def _init():
        m_ref[...] = jnp.full(m_ref.shape, _NEG_INF, dtype=jnp.float32)
        l_ref[...] = jnp.zeros(l_ref.shape, dtype=jnp.float32)

    f_row = f_row_ref[...]               # (TM, D) original dtype
    f_colT = f_colT_ref[...]             # (D, TN) original dtype (pre-transposed f)

    if fold_scale:
        # f32 MXU operands: fold 1/tau into the (TM, D) LHS instead of
        # multiplying the (TM, TN) logits.
        lhs = f_row.astype(jnp.float32) * inv_tau
        logits = jax.lax.dot_general(
            lhs, f_colT.astype(jnp.float32),
            dimension_numbers=(((1,), (0,)), ((), ())),
            preferred_element_type=jnp.float32)                  # (TM, TN) f32
    else:
        logits = jax.lax.dot_general(
            f_row.astype(mxu_dtype), f_colT.astype(mxu_dtype),
            dimension_numbers=(((1,), (0,)), ((), ())),
            preferred_element_type=jnp.float32) * inv_tau        # (TM, TN) f32

    if mask_cols:  # ragged last column block reads don't-care data
        col = j * tn + jax.lax.broadcasted_iota(jnp.int32, (tm, tn), 1)
        logits = jnp.where(col < n, logits, _NEG_INF)

    if bounded_logits:
        # L2-normalized features: logits <= 1/tau -> constant shift, no XLU max
        # and no extra pass over the logits tile.
        l_ref[...] += jnp.sum(jnp.exp(logits - inv_tau), axis=1, keepdims=True)
    else:
        # Online (streaming) log-sum-exp carry across column blocks.
        m_prev = m_ref[...]
        m_new = jnp.maximum(m_prev, jnp.max(logits, axis=1, keepdims=True))
        l_ref[...] = (l_ref[...] * jnp.exp(m_prev - m_new)
                      + jnp.sum(jnp.exp(logits - m_new), axis=1, keepdims=True))
        m_ref[...] = m_new

    @pl.when(j == n_col_blocks - 1)
    def _finalize():
        # Positive (diagonal) logits straight from the row block -- no NxN mask.
        f_row32 = f_row.astype(jnp.float32)
        diag = jnp.sum(f_row32 * f_row32, axis=1, keepdims=True) * inv_tau
        if bounded_logits:
            lse = jnp.log(l_ref[...]) + inv_tau
        else:
            lse = jnp.log(l_ref[...]) + m_ref[...]
        per_row = lse - diag                                     # (TM, 1)
        if mask_rows:  # ragged last row block: mask rows past N
            row = i * tm + jax.lax.broadcasted_iota(jnp.int32, (tm, 1), 0)
            per_row = jnp.where(row < n, per_row, 0.0)
        block_sum = jnp.sum(per_row)
        # Lane-dense partial-sum tile; wrapper reduces across row blocks.
        part_ref[...] = jnp.broadcast_to(block_sum, part_ref.shape)


def _footprint_bytes(tm, tn, d, itemsize):
    """Approximate per-core VMEM footprint of one grid step."""
    return (2 * tm * d * itemsize          # row block (double-buffered)
            + 2 * d * tn * itemsize        # f^T column block (double-buffered)
            + tm * tn * 4                  # f32 logits tile
            + (tm + tn) * d * 4            # scaled / casted MXU operand copies
            + 2 * tm * _LANE * 4           # online-LSE carries (lane padded)
            + 2 * _SUBLANE * _LANE * 4)    # partial-sum output blocks


def _choose_tiles(n, d, itemsize, budget):
    """Largest (TM, TN) row/column tiles that stay under the VMEM budget."""
    tm = n if n <= 256 else 256            # full rows or MXU-friendly 256
    while True:
        if n <= _LANE or _footprint_bytes(tm, n, d, itemsize) <= budget:
            return tm, n                    # whole column extent fits on-chip
        # footprint(tm, tn) = footprint(tm, 0) + per_col * tn  (exact)
        per_col = tm * 4 + 2 * d * itemsize + d * 4
        spare = budget - _footprint_bytes(tm, 0, d, itemsize)
        tn = (spare // per_col) // _LANE * _LANE
        if tn >= _LANE:
            return tm, min(n, tn)
        if tm <= _SUBLANE:                  # pathological D: minimal legal tiles
            return tm, min(n, _LANE)
        tm = max(_SUBLANE, (tm // 2) // _SUBLANE * _SUBLANE)


def intra_domain_infonce_loss(f: jax.Array, tau: float, *,
                              mxu_dtype=None,
                              assume_normalized: bool = False,
                              min_pallas_elems: int = 4096) -> jax.Array:
    """Pallas implementation of IntraDomainInfoNCELoss.forward."""
    n, d = f.shape
    inv_tau = 1.0 / float(tau)

    # Tiny inputs: a single-step pallas_call is pure launch overhead and the
    # matmul is far below MXU/(8,128) granularity -- plain XLA is faster.
    if n < 2 * _SUBLANE or n * d < min_pallas_elems:
        f32 = f.astype(jnp.float32)
        logits = jnp.dot(f32, f32.T) * inv_tau
        m = jnp.max(logits, axis=1, keepdims=True)
        lse = jnp.log(jnp.sum(jnp.exp(logits - m), axis=1)) + m[:, 0]
        diag = jnp.sum(f32 * f32, axis=1) * inv_tau
        return jnp.mean(lse - diag)

    if mxu_dtype is None:
        mxu_dtype = f.dtype                 # bf16 stays bf16 on the MXU
    mxu_dtype = jnp.dtype(mxu_dtype)
    fold_scale = (mxu_dtype == jnp.dtype(jnp.float32))

    itemsize = jnp.dtype(f.dtype).itemsize
    try:   # per-core VMEM (v5e/v6e: 128 MiB, v7x: 64 MiB); conservative fallback
        vmem_cap = int(pltpu.get_tpu_info().vmem_capacity_bytes)
    except Exception:
        vmem_cap = 64 * 1024 * 1024
    budget = int(vmem_cap * 0.65)

    tm, tn = _choose_tiles(n, d, itemsize, budget)
    num_row_blocks = pl.cdiv(n, tm)
    num_col_blocks = pl.cdiv(n, tn)

    footprint = _footprint_bytes(tm, tn, d, itemsize)
    vmem_limit = int(min(max(footprint * 5 // 4 + (4 << 20), 32 << 20),
                         vmem_cap - (4 << 20)))

    kernel = functools.partial(
        _infonce_kernel, inv_tau=inv_tau, n=n, tm=tm, tn=tn,
        fold_scale=fold_scale, bounded_logits=assume_normalized,
        mxu_dtype=mxu_dtype,
        mask_rows=(n % tm != 0), mask_cols=(n % tn != 0))

    # One-time wrapper transpose: MXU sees (TM,D)x(D,TN), no per-step RHS xpose.
    f_t = jnp.swapaxes(f, 0, 1)             # (D, N)

    partials = pl.pallas_call(
        kernel,
        out_shape=jax.ShapeDtypeStruct((num_row_blocks * _SUBLANE, _LANE),
                                       jnp.float32),
        grid_spec=pltpu.PrefetchScalarGridSpec(
            num_scalar_prefetch=0,
            grid=(num_row_blocks, num_col_blocks),
            in_specs=[
                pl.BlockSpec((tm, d), lambda i, j: (i, 0)),   # row block of f
                pl.BlockSpec((d, tn), lambda i, j: (0, j)),   # column block of f^T
            ],
            out_specs=pl.BlockSpec((_SUBLANE, _LANE), lambda i, j: (i, 0)),
            scratch_shapes=[pltpu.VMEM((tm, 1), jnp.float32),   # online-LSE max m
                            pltpu.VMEM((tm, 1), jnp.float32)],  # online-LSE sum l
        ),
        compiler_params=pltpu.CompilerParams(
            dimension_semantics=("parallel", "arbitrary"),
            vmem_limit_bytes=vmem_limit,
        ),
    )(f, f_t)

    # Each row block broadcast its scalar partial over one (8, 128) tile.
    return jnp.sum(partials[::_SUBLANE, 0]) / jnp.float32(n)


def _reference(f: jax.Array, tau: float) -> jax.Array:
    f32 = f.astype(jnp.float32)
    sim = jnp.exp(jnp.dot(f32, f32.T) / tau)
    pos = jnp.diag(sim)
    neg = jnp.sum(sim, axis=1) - pos
    return -jnp.mean(jnp.log(pos / (pos + neg)))


if __name__ == "__main__":
    # tau from config.training_config.tau (deterministic synthetic value).
    tau = 0.5
    key = jax.random.PRNGKey(0)
    k_main, k_small = jax.random.split(key)

    # Small shape implied by the forward: f is (batch, hidden).
    n, d = 128, 64
    f = jax.random.normal(k_main, (n, d), dtype=jnp.float32)
    f = f / jnp.linalg.norm(f, axis=1, keepdims=True)   # typical InfoNCE features

    loss = intra_domain_infonce_loss(f, tau)
    jax.block_until_ready(loss)
    ref = _reference(f, tau)
    assert jnp.allclose(loss, ref, rtol=1e-5, atol=1e-5), (loss, ref)

    # Normalized-feature fast path (constant LSE shift, no per-row XLU max).
    loss_norm = intra_domain_infonce_loss(f, tau, assume_normalized=True)
    jax.block_until_ready(loss_norm)
    assert jnp.allclose(loss_norm, ref, rtol=1e-5, atol=1e-5), (loss_norm, ref)

    # Tiny-input guard: falls back to plain XLA, same semantics.
    f_small = jax.random.normal(k_small, (8, 32), dtype=jnp.float32)
    f_small = f_small / jnp.linalg.norm(f_small, axis=1, keepdims=True)
    loss_small = intra_domain_infonce_loss(f_small, tau)
    jax.block_until_ready(loss_small)
    assert jnp.allclose(loss_small, _reference(f_small, tau),
                        rtol=1e-5, atol=1e-5), loss_small

    print("KERNEL_OK")
</pallas_src>

<mosaic_0001>
module attributes {stable_mosaic.version = 11 : i64} {
  func.func @_infonce_kernel(%arg0: i32, %arg1: i32, %arg2: memref<128x64xf32, #tpu.memory_space<vmem>>, %arg3: memref<64x128xf32, #tpu.memory_space<vmem>>, %arg4: memref<8x128xf32, #tpu.memory_space<vmem>>, %arg5: memref<128x1xf32, #tpu.memory_space<vmem>>, %arg6: memref<128x1xf32, #tpu.memory_space<vmem>>) attributes {dimension_semantics = [#tpu.dimension_semantics<parallel>, #tpu.dimension_semantics<arbitrary>], iteration_bounds = array<i64: 1, 1>, scalar_prefetch = 0 : i64, scratch_operands = 2 : i64, tpu.core_type = #tpu.core_type<tc>, window_params = [{transform_indices = @transform_0, window_bounds = array<i64: 128, 64>}, {transform_indices = @transform_1, window_bounds = array<i64: 64, 128>}, {transform_indices = @transform_2, window_bounds = array<i64: 8, 128>}]} {
    %c0_i32 = arith.constant 0 : i32
    %0 = arith.cmpi eq, %arg1, %c0_i32 : i32
    %1 = arith.extui %0 : i1 to i32
    %c0_i32_0 = arith.constant 0 : i32
    %2 = arith.cmpi ne, %1, %c0_i32_0 : i32
    scf.if %2 {
      %cst_17 = arith.constant -1.000000e+30 : f32
      %27 = vector.broadcast %cst_17 : f32 to vector<128x1xf32>
      %c0_18 = arith.constant 0 : index
      %c0_19 = arith.constant 0 : index
      %28 = vector.load %arg5[%c0_18, %c0_19] : memref<128x1xf32, #tpu.memory_space<vmem>>, vector<128x1xf32>
      tpu.vector_store %arg5[%c0_18, %c0_19], %27 {strides = array<i32>} : memref<128x1xf32, #tpu.memory_space<vmem>>, vector<128x1xf32>,
      %cst_20 = arith.constant 0.000000e+00 : f32
      %29 = vector.broadcast %cst_20 : f32 to vector<128x1xf32>
      %c0_21 = arith.constant 0 : index
      %c0_22 = arith.constant 0 : index
      %30 = vector.load %arg6[%c0_21, %c0_22] : memref<128x1xf32, #tpu.memory_space<vmem>>, vector<128x1xf32>
      tpu.vector_store %arg6[%c0_21, %c0_22], %29 {strides = array<i32>} : memref<128x1xf32, #tpu.memory_space<vmem>>, vector<128x1xf32>,
    } else {
    }
    %c0 = arith.constant 0 : index
    %c0_1 = arith.constant 0 : index
    %3 = vector.load %arg2[%c0, %c0_1] : memref<128x64xf32, #tpu.memory_space<vmem>>, vector<128x64xf32>
    %c0_2 = arith.constant 0 : index
    %c0_3 = arith.constant 0 : index
    %4 = vector.load %arg3[%c0_2, %c0_3] : memref<64x128xf32, #tpu.memory_space<vmem>>, vector<64x128xf32>
    %cst = arith.constant 2.000000e+00 : f32
    %5 = vector.broadcast %cst : f32 to vector<128x64xf32>
    %6 = arith.mulf %3, %5 : vector<128x64xf32>
    %cst_4 = arith.constant dense<0.000000e+00> : vector<128x128xf32>
    %7 = tpu.matmul %6, %4, %cst_4 {dimension_numbers = #tpu.dot_dimension_numbers<[1], [0], [0], [1], [0, 0, 1, 1], [], []>} : vector<128x64xf32>, vector<64x128xf32>, vector<128x128xf32> -> vector<128x128xf32>
    %c0_5 = arith.constant 0 : index
    %c0_6 = arith.constant 0 : index
    %8 = vector.load %arg5[%c0_5, %c0_6] : memref<128x1xf32, #tpu.memory_space<vmem>>, vector<128x1xf32>
    %cst_7 = arith.constant dense<0xFF800000> : vector<128xf32>
    %9 = vector.multi_reduction <maximumf>, %7, %cst_7 [1] : vector<128x128xf32> to vector<128xf32>
    %10 = vector.shape_cast %9 : vector<128xf32> to vector<128x1xf32>
    %11 = arith.maximumf %8, %10 : vector<128x1xf32>
    %c0_8 = arith.constant 0 : index
    %c0_9 = arith.constant 0 : index
    %12 = vector.load %arg6[%c0_8, %c0_9] : memref<128x1xf32, #tpu.memory_space<vmem>>, vector<128x1xf32>
    %13 = arith.subf %8, %11 : vector<128x1xf32>
    %14 = math.exp %13 : vector<128x1xf32>
    %15 = arith.mulf %12, %14 : vector<128x1xf32>
    %16 = vector.broadcast %11 : vector<128x1xf32> to vector<128x128xf32>
    %17 = arith.subf %7, %16 : vector<128x128xf32>
    %18 = math.exp %17 : vector<128x128xf32>
    %cst_10 = arith.constant dense<0.000000e+00> : vector<128xf32>
    %19 = vector.multi_reduction <add>, %18, %cst_10 [1] : vector<128x128xf32> to vector<128xf32>
    %20 = vector.shape_cast %19 : vector<128xf32> to vector<128x1xf32>
    %21 = arith.addf %15, %20 : vector<128x1xf32>
    %c0_11 = arith.constant 0 : index
    %c0_12 = arith.constant 0 : index
    %22 = vector.load %arg6[%c0_11, %c0_12] : memref<128x1xf32, #tpu.memory_space<vmem>>, vector<128x1xf32>
    tpu.vector_store %arg6[%c0_11, %c0_12], %21 {strides = array<i32>} : memref<128x1xf32, #tpu.memory_space<vmem>>, vector<128x1xf32>,
    %c0_13 = arith.constant 0 : index
    %c0_14 = arith.constant 0 : index
    %23 = vector.load %arg5[%c0_13, %c0_14] : memref<128x1xf32, #tpu.memory_space<vmem>>, vector<128x1xf32>
    tpu.vector_store %arg5[%c0_13, %c0_14], %11 {strides = array<i32>} : memref<128x1xf32, #tpu.memory_space<vmem>>, vector<128x1xf32>,
    %c0_i32_15 = arith.constant 0 : i32
    %24 = arith.cmpi eq, %arg1, %c0_i32_15 : i32
    %25 = arith.extui %24 : i1 to i32
    %c0_i32_16 = arith.constant 0 : i32
    %26 = arith.cmpi ne, %25, %c0_i32_16 : i32
    scf.if %26 {
      %27 = arith.mulf %3, %3 : vector<128x64xf32>
      %cst_17 = arith.constant dense<0.000000e+00> : vector<128xf32>
      %28 = vector.multi_reduction <add>, %27, %cst_17 [1] : vector<128x64xf32> to vector<128xf32>
      %29 = vector.shape_cast %28 : vector<128xf32> to vector<128x1xf32>
      %cst_18 = arith.constant 2.000000e+00 : f32
      %30 = vector.broadcast %cst_18 : f32 to vector<128x1xf32>
      %31 = arith.mulf %29, %30 : vector<128x1xf32>
      %c0_19 = arith.constant 0 : index
      %c0_20 = arith.constant 0 : index
      %32 = vector.load %arg6[%c0_19, %c0_20] : memref<128x1xf32, #tpu.memory_space<vmem>>, vector<128x1xf32>
      %33 = math.log %32 : vector<128x1xf32>
      %c0_21 = arith.constant 0 : index
      %c0_22 = arith.constant 0 : index
      %34 = vector.load %arg5[%c0_21, %c0_22] : memref<128x1xf32, #tpu.memory_space<vmem>>, vector<128x1xf32>
      %35 = arith.addf %33, %34 : vector<128x1xf32>
      %36 = arith.subf %35, %31 : vector<128x1xf32>
      %37 = vector.shape_cast %36 : vector<128x1xf32> to vector<1x128x1xf32>
      %cst_23 = arith.constant dense<0.000000e+00> : vector<1xf32>
      %38 = vector.multi_reduction <add>, %37, %cst_23 [1, 2] : vector<1x128x1xf32> to vector<1xf32>
      %39 = vector.shape_cast %38 : vector<1xf32> to vector<1x1x1xf32>
      %40 = vector.extract %39[0, 0, 0] : f32 from vector<1x1x1xf32>
      %41 = vector.broadcast %40 : f32 to vector<8x128xf32>
      %c0_24 = arith.constant 0 : index
      %c0_25 = arith.constant 0 : index
      %42 = vector.load %arg4[%c0_24, %c0_25] : memref<8x128xf32, #tpu.memory_space<vmem>>, vector<8x128xf32>
      tpu.vector_store %arg4[%c0_24, %c0_25], %41 {strides = array<i32>} : memref<8x128xf32, #tpu.memory_space<vmem>>, vector<8x128xf32>,
    } else {
    }
    return
  }
  func.func @transform_0(%arg0: i32, %arg1: i32) -> (i32, i32) {
    %c0_i32 = arith.constant 0 : i32
    %c0_i32_0 = arith.constant 0 : i32
    return %arg0, %c0_i32 : i32, i32
  }
  func.func @transform_1(%arg0: i32, %arg1: i32) -> (i32, i32) {
    %c0_i32 = arith.constant 0 : i32
    %c0_i32_0 = arith.constant 0 : i32
    return %c0_i32, %arg1 : i32, i32
  }
  func.func @transform_2(%arg0: i32, %arg1: i32) -> (i32, i32) {
    %c0_i32 = arith.constant 0 : i32
    %c0_i32_0 = arith.constant 0 : i32
    return %arg0, %c0_i32 : i32, i32
  }
}

</mosaic_0001>

<bundles_post_ra>
// kernel: tpu_custom_call.1
= control target key start
LH: loop header
LB: loop body
LE: loop exit
PB: predicated region body
PF: predicated region fallthrough
CT: control target
= control target key end

     0   :  { %s1498_s0 = inlined_call_operand.vmem [shape: f32[128,64], index: 0, kind: input, shape index: {}]   ;;  %s1499_s1 = inlined_call_operand.vmem [shape: f32[64,128], index: 1, kind: input, shape index: {}]   ;;  %s1500_s2 = inlined_call_operand.hbm [shape: f32[8,128], index: 2, kind: output, shape index: {}]  }
   0x1   :  { %v72_v0 = vld [vmem:[%s1499_s1 + $0x38] sm:$0xff]  ;;  %v71_v1 = vld [vmem:[%s1499_s1 + $0x30] sm:$0xff]  ;;  %v70_v2 = vld [vmem:[%s1499_s1 + $0x28] sm:$0xff] }
   0x2   :  { %146 = vmatpush.msra.mxu0 %v72_v0  ;;  %811 = vmatpush.msra.mxu3 %v72_v0  ;;  %v69_v3 = vld [vmem:[%s1499_s1 + $0x20] sm:$0xff]  ;;  %v68_v4 = vld [vmem:[%s1499_s1 + $0x18] sm:$0xff] }
   0x3   :  { %809 = vmatpush.msra.mxu1 %v72_v0  ;;  %810 = vmatpush.msra.mxu2 %v72_v0 }
   0x4   :  { %147 = vmatpush.msra.mxu0 %v71_v1  ;;  %814 = vmatpush.msra.mxu3 %v71_v1 }
   0x5   :  { %812 = vmatpush.msra.mxu1 %v71_v1  ;;  %813 = vmatpush.msra.mxu2 %v71_v1 }
   0x6   :  { %148 = vmatpush.msra.mxu0 %v70_v2  ;;  %817 = vmatpush.msra.mxu3 %v70_v2 }
   0x7   :  { %815 = vmatpush.msra.mxu1 %v70_v2  ;;  %816 = vmatpush.msra.mxu2 %v70_v2 }
   0x8   :  { %149 = vmatpush.msra.mxu0 %v69_v3  ;;  %820 = vmatpush.msra.mxu3 %v69_v3 }
   0x9   :  { %7 = vsyncpa [#allocation5], 0  ;;  %v67_v5 = vld [vmem:[%s1499_s1 + $0x10] sm:$0xff]  ;;  %818 = vmatpush.msra.mxu1 %v69_v3  ;;  %819 = vmatpush.msra.mxu2 %v69_v3  ;;  %v49_v6 = vld [vmem:[%s1498_s0] sm:$0xff]  ;;  %vm89_vm0 = vcmask 523264   ;;  %vm16_vm1 = vcmask 7168  }
   0xa   :  { %150 = vmatpush.msra.mxu0 %v68_v4  ;;  %823 = vmatpush.msra.mxu3 %v68_v4  ;;  %v1007_v7 = vld [vmem:[%s1498_s0 + $0x60] sm:$0xff]  ;;  %v66_v8 = vld [vmem:[%s1499_s1 + $0x8] sm:$0xff]  ;;  %v73_v13 = vmul.f32 2.0, %v49_v6  ;;  %v559_v16 = vmul.f32 %v49_v6, %v49_v6  ;;  %v1060_v28 = vld [vmem:[%s1498_s0 + $0x70] sm:$0xff]  ;;  %v964_v0 = vmov -1e+30  }
   0xb   :  { %821 = vmatpush.msra.mxu1 %v68_v4  ;;  %822 = vmatpush.msra.mxu2 %v68_v4  ;;  %v1015_v9 = vld [vmem:[%s1498_s0 + $0x20] sm:$0xff]  ;;  %v50_v11 = vld [vmem:[%s1498_s0 + $0x8] sm:$0xff]  ;;  %v85_v14 = vmul.f32 2.0, %v1007_v7  ;;  %v51_v29 = vld [vmem:[%s1498_s0 + $0x10] sm:$0xff]  ;;  %v87_v32 = vmul.f32 2.0, %v1060_v28  ;;  %17 = vst.msk [vmem:[#allocation2] sm:$0xff] %vm16_vm1, %v964_v0 }
   0xc   :  { %151 = vmatpush.msra.mxu0 %v67_v5  ;;  %826 = vmatpush.msra.mxu3 %v67_v5  ;;  %v1020_v10 = vld [vmem:[%s1498_s0 + $0x40] sm:$0xff]  ;;  %v560_v15 = vmul.f32 %v50_v11, %v50_v11  ;;  %v77_v17 = vmul.f32 2.0, %v1015_v9  ;;  %v575_v20 = vsel %vm89_vm0, %v559_v16, 0.0  ;;  %v1038_v21 = vld [vmem:[%s1498_s0 + $0x68] sm:$0xff]  ;;  %v74_v24 = vmul.f32 2.0, %v50_v11  ;;  %v1070_v30 = vld [vmem:[%s1498_s0 + $0x30] sm:$0xff] }
   0xd   :  { %v65_v12 = vld [vmem:[%s1499_s1] sm:$0xff]  ;;  %824 = vmatpush.msra.mxu1 %v67_v5  ;;  %825 = vmatpush.msra.mxu2 %v67_v5  ;;  %v81_v18 = vmul.f32 2.0, %v1020_v10  ;;  %v1045_v22 = vld [vmem:[%s1498_s0 + $0x48] sm:$0xff]  ;;  %v86_v25 = vmul.f32 2.0, %v1038_v21  ;;  %v1075_v31 = vld [vmem:[%s1498_s0 + $0x50] sm:$0xff]  ;;  %v75_v33 = vmul.f32 2.0, %v51_v29  ;;  %v561_v44 = vmul.f32 %v51_v29, %v51_v29 }
   0xe   :  { %152 = vmatpush.msra.mxu0 %v66_v8  ;;  %829 = vmatpush.msra.mxu3 %v66_v8  ;;  %v578_v19 = vsel %vm89_vm0, %v560_v15, 0.0  ;;  %v1050_v23 = vld [vmem:[%s1498_s0 + $0x28] sm:$0xff]  ;;  %v82_v26 = vmul.f32 2.0, %v1045_v22  ;;  %v79_v34 = vmul.f32 2.0, %v1070_v30  ;;  %v83_v35 = vmul.f32 2.0, %v1075_v31  ;;  %v1085_v36 = vld [vmem:[%s1498_s0 + $0x78] sm:$0xff] }
   0xf   :  { %827 = vmatpush.msra.mxu1 %v66_v8  ;;  %828 = vmatpush.msra.mxu2 %v66_v8  ;;  %v78_v27 = vmul.f32 2.0, %v1050_v23  ;;  %v52_v37 = vld [vmem:[%s1498_s0 + $0x18] sm:$0xff]  ;;  %v88_v40 = vmul.f32 2.0, %v1085_v36  ;;  %v581_v45 = vsel %vm89_vm0, %v561_v44, 0.0  ;;  %18 = vst.msk [vmem:[#allocation2 + $0x8] sm:$0xff] %vm16_vm1, %v964_v0  ;;  %v965_v1 = vmov 0  }
  0x10   :  { %153 = vmatpush.msra.mxu0 %v65_v12  ;;  %832 = vmatpush.msra.mxu3 %v65_v12  ;;  %v1095_v38 = vld [vmem:[%s1498_s0 + $0x58] sm:$0xff]  ;;  %v76_v41 = vmul.f32 2.0, %v52_v37  ;;  %v562_v46 = vmul.f32 %v52_v37, %v52_v37  ;;  %19 = vst.msk [vmem:[#allocation2 + $0x10] sm:$0xff] %vm16_vm1, %v964_v0  ;;  %v966_v2 = vmov 0.0   ;;  %s784_s3 = sshll.u32 %s1500_s2, 4  ;;  %s785_s3 = int_to_ptr.hbm [resolvable:$true] %s784_s3 }
  0x11   :  { %793 = vmatmul.msk.f32.vlgmr.msra.gmra.mxu0 %vm89_vm0, %v73_v13  ;;  %805 = vmatmul.msk.f32.vlgmr.msra.gmra.mxu3 %vm89_vm0, %v85_v14  ;;  %v1100_v39 = vld [vmem:[%s1498_s0 + $0x38] sm:$0xff]  ;;  %v84_v42 = vmul.f32 2.0, %v1095_v38  ;;  %20 = vst.msk [vmem:[#allocation2 + $0x18] sm:$0xff] %vm16_vm1, %v964_v0  ;;  %s967_s0 = smov [#allocation4]  }
  0x12   :  { %830 = vmatpush.msra.mxu1 %v65_v12  ;;  %831 = vmatpush.msra.mxu2 %v65_v12  ;;  %v80_v43 = vmul.f32 2.0, %v1100_v39  ;;  %v584_v47 = vsel %vm89_vm0, %v562_v46, 0.0  ;;  %21 = vst.msk [vmem:[#allocation2 + $0x20] sm:$0xff] %vm16_vm1, %v964_v0  ;;  %v1197_v6 = vld [vmem:[#allocation2] sm:$0xff]  ;;  %s782_s28 = sshll.u32 %s967_s0, 4  ;;  %s783_s28 = int_to_ptr.vmem [resolvable:$true] %s782_s28 }
  0x13   :  { %797 = vmatmul.msk.f32.vlgmr.msra.gmra.mxu1 %vm89_vm0, %v77_v17  ;;  %801 = vmatmul.msk.f32.vlgmr.msra.gmra.mxu2 %vm89_vm0, %v81_v18  ;;  %22 = vst.msk [vmem:[#allocation2 + $0x28] sm:$0xff] %vm16_vm1, %v964_v0 }
  0x14   :  { %579 = vadd.xlane.f32.xlu0 %v578_v19  ;;  %576 = vadd.xlane.f32.xlu2 %v575_v20  ;;  %23 = vst.msk [vmem:[#allocation2 + $0x30] sm:$0xff] %vm16_vm1, %v964_v0 }
  0x15   :  { %585 = vadd.xlane.f32.xlu1 %v584_v47  ;;  %24 = vst.msk [vmem:[#allocation2 + $0x38] sm:$0xff] %vm16_vm1, %v964_v0  ;;  %840 = vset.pattern.permute.xlu0 %v965_v1 }
  0x16   :  { %25 = vst.msk [vmem:[#allocation2 + $0x40] sm:$0xff] %vm16_vm1, %v964_v0  ;;  %839 = vset.pattern.permute.xlu1 %v965_v1  ;;  %841 = vset.pattern.permute.xlu2 %v965_v1 }
  0x17   :  { %26 = vst.msk [vmem:[#allocation2 + $0x48] sm:$0xff] %vm16_vm1, %v964_v0  ;;  %v1263_v46 = vld [vmem:[#allocation2 + $0x10] sm:$0xff] }
  0x18   :  { %27 = vst.msk [vmem:[#allocation2 + $0x50] sm:$0xff] %vm16_vm1, %v964_v0 }
  0x19   :  { %794 = vmatmul.msk.f32.gmra.mxu0 %vm89_vm0, %v74_v24  ;;  %806 = vmatmul.msk.f32.gmra.mxu3 %vm89_vm0, %v86_v25  ;;  %28 = vst.msk [vmem:[#allocation2 + $0x58] sm:$0xff] %vm16_vm1, %v964_v0  ;;  %v1199_v11 = vld [vmem:[#allocation2 + $0x20] sm:$0xff] }
  0x1a   :  { %29 = vst.msk [vmem:[#allocation2 + $0x60] sm:$0xff] %vm16_vm1, %v964_v0 }
  0x1b   :  { %802 = vmatmul.msk.f32.gmra.mxu2 %vm89_vm0, %v82_v26  ;;  %798 = vmatmul.msk.f32.gmra.mxu1 %vm89_vm0, %v78_v27  ;;  %30 = vst.msk [vmem:[#allocation2 + $0x68] sm:$0xff] %vm16_vm1, %v964_v0 }
  0x1c   :  { %582 = vadd.xlane.f32.xlu2 %v581_v45  ;;  %31 = vst.msk [vmem:[#allocation2 + $0x70] sm:$0xff] %vm16_vm1, %v964_v0 }
  0x1d   :  { %32 = vst.msk [vmem:[#allocation2 + $0x78] sm:$0xff] %vm16_vm1, %v964_v0  ;;  %v1220_v20 = vld [vmem:[#allocation2 + $0x40] sm:$0xff] }
  0x1e   :  { %33 = vst.msk [vmem:[#allocation3] sm:$0xff] %vm16_vm1, %v966_v2  ;;  %v1269_v0 = vld [vmem:[#allocation2 + $0x48] sm:$0xff] }
  0x1f   :  { %34 = vst.msk [vmem:[#allocation3 + $0x8] sm:$0xff] %vm16_vm1, %v966_v2 }
  0x20   :  { %35 = vst.msk [vmem:[#allocation3 + $0x10] sm:$0xff] %vm16_vm1, %v966_v2  ;;  %v1303_v44 = vld [vmem:[#allocation2 + $0x58] sm:$0xff] }
  0x21   :  { %807 = vmatmul.msk.f32.gmra.mxu3 %vm89_vm0, %v87_v32  ;;  %795 = vmatmul.msk.f32.gmra.mxu0 %vm89_vm0, %v75_v33  ;;  %36 = vst.msk [vmem:[#allocation3 + $0x18] sm:$0xff] %vm16_vm1, %v966_v2  ;;  %v1218_v18 = vld [vmem:[#allocation2 + $0x60] sm:$0xff]  ;;  %v1240_v33 = vld [vmem:[#allocation2 + $0x8] sm:$0xff] }
  0x22   :  { %37 = vst.msk [vmem:[#allocation3 + $0x20] sm:$0xff] %vm16_vm1, %v966_v2  ;;  %v1234_v29 = vld [vmem:[#allocation2 + $0x68] sm:$0xff] }
  0x23   :  { %799 = vmatmul.msk.f32.gmra.mxu1 %vm89_vm0, %v79_v34  ;;  %803 = vmatmul.msk.f32.gmra.mxu2 %vm89_vm0, %v83_v35  ;;  %38 = vst.msk [vmem:[#allocation3 + $0x28] sm:$0xff] %vm16_vm1, %v966_v2 }
  0x24   :  { %39 = vst.msk [vmem:[#allocation3 + $0x30] sm:$0xff] %vm16_vm1, %v966_v2  ;;  %v1328_v17 = vld [vmem:[#allocation2 + $0x78] sm:$0xff] }
  0x25   :  { %40 = vst.msk [vmem:[#allocation3 + $0x38] sm:$0xff] %vm16_vm1, %v966_v2 }
  0x26   :  { %41 = vst.msk [vmem:[#allocation3 + $0x40] sm:$0xff] %vm16_vm1, %v966_v2 }
  0x27   :  { %42 = vst.msk [vmem:[#allocation3 + $0x48] sm:$0xff] %vm16_vm1, %v966_v2 }
  0x28   :  { %43 = vst.msk [vmem:[#allocation3 + $0x50] sm:$0xff] %vm16_vm1, %v966_v2 }
  0x29   :  { %808 = vmatmul.msk.f32.gmra.mxu3 %vm89_vm0, %v88_v40  ;;  %796 = vmatmul.msk.f32.gmra.mxu0 %vm89_vm0, %v76_v41  ;;  %44 = vst.msk [vmem:[#allocation3 + $0x58] sm:$0xff] %vm16_vm1, %v966_v2  ;;  %v1245_v40 = vld [vmem:[#allocation2 + $0x28] sm:$0xff] }
  0x2a   :  { %45 = vst.msk [vmem:[#allocation3 + $0x60] sm:$0xff] %vm16_vm1, %v966_v2 }
  0x2b   :  { %804 = vmatmul.msk.f32.gmra.mxu2 %vm89_vm0, %v84_v42  ;;  %800 = vmatmul.msk.f32.gmra.mxu1 %vm89_vm0, %v80_v43  ;;  %46 = vst.msk [vmem:[#allocation3 + $0x68] sm:$0xff] %vm16_vm1, %v966_v2  ;;  %v1298_v42 = vld [vmem:[#allocation2 + $0x30] sm:$0xff] }
  0x2c   :  { %47 = vst.msk [vmem:[#allocation3 + $0x70] sm:$0xff] %vm16_vm1, %v966_v2 }
  0x2d   :  { %48 = vst.msk [vmem:[#allocation3 + $0x78] sm:$0xff] %vm16_vm1, %v966_v2 }
  0x2e   :  { %1517 = vst [vmem:[#allocation11_spill] sm:$0xff] %v1234_v29 }
  0x2f   :  { %1521 = vst [vmem:[#allocation15_spill] sm:$0xff] %v1298_v42 }
  0x30   :  { %1522 = vst [vmem:[#allocation16_spill] sm:$0xff] %v1303_v44 }
  0x31   :  { %1525 = vst [vmem:[#allocation19_spill] sm:$0xff] %v1328_v17 }
  0x87   :  { %v1180_v3 = vpop.xlane.xlu2 %576  ;;  %v1190_v4 = vpop.xlane.xlu0 %579 }
  0x88   :  { %1513 = vst [vmem:[#allocation7_spill] sm:$0xff] %v1180_v3  ;;  %v1212_v16 = vpop.xlane.xlu1 %585 }
  0x89   :  { %1514 = vst [vmem:[#allocation8_spill] sm:$0xff] %v1190_v4 }
  0x8a   :  { %1516 = vst [vmem:[#allocation10_spill] sm:$0xff] %v1212_v16 }
  0x8e   :  { %v1111_v48 = vpop.f32.mrf.mxu0 }
  0x8f   :  { %219 = vmax.xlane.f32.xlu0 %v1111_v48  ;;  %v1194_v5 = vpop.xlane.xlu2 %582 }
  0x90   :  { %v1114_v49 = vpop.f32.mrf.mxu1  ;;  %1515 = vst [vmem:[#allocation9_spill] sm:$0xff] %v1194_v5 }
  0x91   :  { %227 = vmax.xlane.f32.xlu2 %v1114_v49 }
  0x94   :  { %v1117_v50 = vpop.f32.mrf.mxu3 }
  0x96   :  { %v1119_v51 = vpop.f32.mrf.mxu2  ;;  %v1123_v52 = vpop.f32.mrf.mxu0 }
  0x97   :  { %243 = vmax.xlane.f32.xlu0 %v1117_v50 }
  0x98   :  { %v1128_v54 = vpop.f32.mrf.mxu1 }
  0x99   :  { %235 = vmax.xlane.f32.xlu2 %v1119_v51 }
  0x9c   :  { %v1125_v53 = vpop.f32.mrf.mxu3 }
  0x9d   :  { %245 = vmax.xlane.f32.xlu1 %v1125_v53 }
  0x9e   :  { %v1130_v55 = vpop.f32.mrf.mxu2  ;;  %v1134_v56 = vpop.f32.mrf.mxu0 }
  0x9f   :  { %221 = vmax.xlane.f32.xlu0 %v1123_v52 }
  0xa0   :  { %v1143_v59 = vpop.f32.mrf.mxu1 }
  0xa1   :  { %229 = vmax.xlane.f32.xlu2 %v1128_v54 }
  0xa4   :  { %v1140_v58 = vpop.f32.mrf.mxu3 }
  0xa5   :  { %223 = vmax.xlane.f32.xlu1 %v1134_v56 }
  0xa6   :  { %v1137_v57 = vpop.f32.mrf.mxu2  ;;  %v1150_v61 = vpop.f32.mrf.mxu0 }
  0xa7   :  { %237 = vmax.xlane.f32.xlu0 %v1130_v55 }
  0xa8   :  { %v1156_v63 = vpop.f32.mrf.mxu1 }
  0xa9   :  { %247 = vmax.xlane.f32.xlu2 %v1140_v58 }
  0xac   :  { %v1152_v62 = vpop.f32.mrf.mxu3 }
  0xad   :  { %239 = vmax.xlane.f32.xlu1 %v1137_v57 }
  0xae   :  { %v1146_v60 = vpop.f32.mrf.mxu2 }
  0xaf   :  { %231 = vmax.xlane.f32.xlu0 %v1143_v59 }
  0xb1   :  { %241 = vmax.xlane.f32.xlu2 %v1146_v60 }
  0xb5   :  { %225 = vmax.xlane.f32.xlu1 %v1150_v61 }
  0xb7   :  { %249 = vmax.xlane.f32.xlu0 %v1152_v62 }
  0xbd   :  { %233 = vmax.xlane.f32.xlu1 %v1156_v63 }
 0x102   :  { %v220_v8 = vpop.xlane.xlu0 %219 }
 0x103   :  { %v1202_v12 = vmax.f32 %v1197_v6, %v220_v8 }
 0x104   :  { %v228_v13 = vpop.xlane.xlu2 %227 }
 0x105   :  { %540 = vst.msk [vmem:[#allocation2] sm:$0xff] %vm16_vm1, %v1202_v12  ;;  %349 = vperm.xlu1 %839, %v1202_v12   ;;  %v1210_v15 = vmax.f32 %v1199_v11, %v228_v13  ;;  %v1274_v13 = vld [vmem:[#allocation2 + $0x70] sm:$0xff] }
 0x106   :  { %1519 = vst [vmem:[#allocation13_spill] sm:$0xff] %v1274_v13 }
 0x107   :  { %544 = vst.msk [vmem:[#allocation2 + $0x20] sm:$0xff] %vm16_vm1, %v1210_v15 }
 0x10a   :  { %v244_v19 = vpop.xlane.xlu0 %243 }
 0x10b   :  { %v1223_v24 = vmax.f32 %v1218_v18, %v244_v19 }
 0x10c   :  { %v236_v25 = vpop.xlane.xlu2 %235 }
 0x10d   :  { %552 = vst.msk [vmem:[#allocation2 + $0x60] sm:$0xff] %vm16_vm1, %v1223_v24  ;;  %409 = vperm.xlu0 %840, %v1223_v24   ;;  %369 = vperm.xlu1 %839, %v1210_v15   ;;  %v1232_v27 = vmax.f32 %v1220_v20, %v236_v25 }
 0x10f   :  { %548 = vst.msk [vmem:[#allocation2 + $0x40] sm:$0xff] %vm16_vm1, %v1232_v27 }
 0x110   :  { %v246_v34 = vpop.xlane.xlu1 %245 }
 0x111   :  { %v1243_v35 = vmax.f32 %v1234_v29, %v246_v34 }
 0x112   :  { %v222_v37 = vpop.xlane.xlu0 %221 }
 0x113   :  { %1518 = vst [vmem:[#allocation12_spill] sm:$0xff] %v1243_v35  ;;  %v1248_v41 = vmax.f32 %v1240_v33, %v222_v37 }
 0x114   :  { %553 = vst.msk [vmem:[#allocation2 + $0x68] sm:$0xff] %vm16_vm1, %v1243_v35  ;;  %v230_v43 = vpop.xlane.xlu2 %229 }
 0x115   :  { %541 = vst.msk [vmem:[#allocation2 + $0x8] sm:$0xff] %vm16_vm1, %v1248_v41  ;;  %354 = vperm.xlu2 %841, %v1248_v41   ;;  %389 = vperm.xlu1 %839, %v1232_v27   ;;  %v1261_v45 = vmax.f32 %v1245_v40, %v230_v43 }
 0x117   :  { %545 = vst.msk [vmem:[#allocation2 + $0x28] sm:$0xff] %vm16_vm1, %v1261_v45 }
 0x118   :  { %v224_v1 = vpop.xlane.xlu1 %223 }
 0x119   :  { %v1272_v2 = vmax.f32 %v1263_v46, %v224_v1  ;;  %v1292_v1 = vld [vmem:[#allocation2 + $0x50] sm:$0xff] }
 0x11a   :  { %v238_v8 = vpop.xlane.xlu0 %237 }
 0x11b   :  { %v1277_v19 = vmax.f32 %v1269_v0, %v238_v8  ;;  %542 = vst.msk [vmem:[#allocation2 + $0x10] sm:$0xff] %vm16_vm1, %v1272_v2 }
 0x11c   :  { %v248_v34 = vpop.xlane.xlu2 %247 }
 0x11d   :  { %549 = vst.msk [vmem:[#allocation2 + $0x48] sm:$0xff] %vm16_vm1, %v1277_v19  ;;  %394 = vperm.xlu0 %840, %v1277_v19   ;;  %374 = vperm.xlu2 %841, %v1261_v45   ;;  %v1290_v43 = vmax.f32 %v1274_v13, %v248_v34 }
 0x11f   :  { %1520 = vst [vmem:[#allocation14_spill] sm:$0xff] %v1290_v43 }
 0x120   :  { %554 = vst.msk [vmem:[#allocation2 + $0x70] sm:$0xff] %vm16_vm1, %v1290_v43  ;;  %v240_v25 = vpop.xlane.xlu1 %239 }
 0x121   :  { %v1301_v47 = vmax.f32 %v1292_v1, %v240_v25 }
 0x122   :  { %v232_v37 = vpop.xlane.xlu0 %231 }
 0x123   :  { %v1306_v34 = vmax.f32 %v1298_v42, %v232_v37  ;;  %550 = vst.msk [vmem:[#allocation2 + $0x50] sm:$0xff] %vm16_vm1, %v1301_v47  ;;  %v1322_v37 = vld [vmem:[#allocation2 + $0x18] sm:$0xff] }
 0x124   :  { %v242_v8 = vpop.xlane.xlu2 %241 }
 0x125   :  { %1523 = vst [vmem:[#allocation17_spill] sm:$0xff] %v1306_v34  ;;  %359 = vperm.xlu0 %840, %v1272_v2   ;;  %414 = vperm.xlu2 %841, %v1243_v35   ;;  %v1319_v25 = vmax.f32 %v1303_v44, %v242_v8 }
 0x126   :  { %546 = vst.msk [vmem:[#allocation2 + $0x30] sm:$0xff] %vm16_vm1, %v1306_v34  ;;  %379 = vperm.xlu1 %839, %v1306_v34  }
 0x127   :  { %1524 = vst [vmem:[#allocation18_spill] sm:$0xff] %v1319_v25 }
 0x128   :  { %551 = vst.msk [vmem:[#allocation2 + $0x58] sm:$0xff] %vm16_vm1, %v1319_v25  ;;  %v226_v26 = vpop.xlane.xlu1 %225 }
 0x129   :  { %v1331_v14 = vmax.f32 %v1322_v37, %v226_v26 }
 0x12a   :  { %v250_v16 = vpop.xlane.xlu0 %249 }
 0x12b   :  { %v1334_v8 = vmax.f32 %v1328_v17, %v250_v16  ;;  %543 = vst.msk [vmem:[#allocation2 + $0x18] sm:$0xff] %vm16_vm1, %v1331_v14  ;;  %v1347_v16 = vld [vmem:[#allocation2 + $0x38] sm:$0xff] }
 0x12c   :  { %1527 = vst [vmem:[#allocation21_spill] sm:$0xff] %v1347_v16 }
 0x12d   :  { %1526 = vst [vmem:[#allocation20_spill] sm:$0xff] %v1334_v8  ;;  %424 = vperm.xlu0 %840, %v1334_v8   ;;  %399 = vperm.xlu2 %841, %v1301_v47  }
 0x12e   :  { %555 = vst.msk [vmem:[#allocation2 + $0x78] sm:$0xff] %vm16_vm1, %v1334_v8  ;;  %419 = vperm.xlu1 %839, %v1290_v43  }
 0x130   :  { %v234_v26 = vpop.xlane.xlu1 %233 }
 0x131   :  { %v1350_v5 = vmax.f32 %v1347_v16, %v234_v26 }
 0x133   :  { %1528 = vst [vmem:[#allocation22_spill] sm:$0xff] %v1350_v5 }
 0x134   :  { %547 = vst.msk [vmem:[#allocation2 + $0x38] sm:$0xff] %vm16_vm1, %v1350_v5 }
 0x135   :  { %364 = vperm.xlu2 %841, %v1331_v14  }
 0x136   :  { %404 = vperm.xlu1 %839, %v1319_v25  }
 0x13d   :  { %384 = vperm.xlu2 %841, %v1350_v5  }
 0x16f   :  { %v355_v32 = vpop.permute.xlu2 %354 }
 0x170   :  { %v428_v25 = vsub.f32 %v1123_v52, %v355_v32 }
 0x177   :  { %v375_v4 = vpop.permute.xlu2 %374  ;;  %v350_v44 = vpop.permute.xlu1 %349 }
 0x178   :  { %v427_v8 = vsub.f32 %v1111_v48, %v350_v44  ;;  %v445_v44 = vmul.f32 1.442695, %v428_v25 }
 0x17a   :  { %v443_v17 = vmul.f32 1.442695, %v427_v8 }
 0x17c   :  { %842 = vpow2.f32 %v443_v17 }
 0x17f   :  { %v410_v26 = vpop.permute.xlu0 %409  ;;  %v415_v34 = vpop.permute.xlu2 %414 }
 0x180   :  { %v439_v3 = vsub.f32 %v1117_v50, %v410_v26  ;;  %v370_v16 = vpop.permute.xlu1 %369  ;;  %v432_v26 = vsub.f32 %v1128_v54, %v375_v4 }
 0x181   :  { %v431_v42 = vsub.f32 %v1114_v49, %v370_v16 }
 0x182   :  { %v467_v43 = vmul.f32 1.442695, %v439_v3  ;;  %v843_v13 = vpop.eup %842  ;;  %v453_v32 = vmul.f32 1.442695, %v432_v26 }
 0x183   :  { %v451_v35 = vmul.f32 1.442695, %v431_v42  ;;  %475 = vadd.xlane.f32.xlu2 %v843_v13 }
 0x184   :  { %844 = vpow2.f32 %v467_v43 }
 0x185   :  { %846 = vpow2.f32 %v451_v35 }
 0x187   :  { %v400_v5 = vpop.permute.xlu2 %399 }
 0x188   :  { %v390_v29 = vpop.permute.xlu1 %389  ;;  %v437_v49 = vsub.f32 %v1137_v57, %v400_v5 }
 0x189   :  { %v435_v48 = vsub.f32 %v1119_v51, %v390_v29 }
 0x18a   :  { %v845_v17 = vpop.eup %844  ;;  %v463_v35 = vmul.f32 1.442695, %v437_v49 }
 0x18b   :  { %v459_v8 = vmul.f32 1.442695, %v435_v48  ;;  %499 = vadd.xlane.f32.xlu0 %v845_v17  ;;  %v847_v50 = vpop.eup %846  ;;  %v440_v48 = vsub.f32 %v1125_v53, %v415_v34 }
 0x18c   :  { %483 = vadd.xlane.f32.xlu1 %v847_v50 }
 0x18d   :  { %848 = vpow2.f32 %v459_v8 }
 0x18e   :  { %850 = vpow2.f32 %v445_v44 }
 0x18f   :  { %v395_v3 = vpop.permute.xlu0 %394  ;;  %v365_v13 = vpop.permute.xlu2 %364 }
 0x190   :  { %v436_v52 = vsub.f32 %v1130_v55, %v395_v3  ;;  %v430_v43 = vsub.f32 %v1150_v61, %v365_v13  ;;  %v469_v61 = vmul.f32 1.442695, %v440_v48 }
 0x192   :  { %v461_v42 = vmul.f32 1.442695, %v436_v52  ;;  %v449_v5 = vmul.f32 1.442695, %v430_v43 }
 0x193   :  { %v849_v51 = vpop.eup %848 }
 0x194   :  { %v851_v29 = vpop.eup %850  ;;  %852 = vpow2.f32 %v461_v42  ;;  %491 = vadd.xlane.f32.xlu2 %v849_v51  ;;  %v563_v51 = vmul.f32 %v1015_v9, %v1015_v9  ;;  %v566_v9 = vmul.f32 %v1100_v39, %v1100_v39 }
 0x195   :  { %854 = vpow2.f32 %v453_v32  ;;  %477 = vadd.xlane.f32.xlu1 %v851_v29 }
 0x196   :  { %856 = vpow2.f32 %v463_v35 }
 0x197   :  { %v360_v54 = vpop.permute.xlu0 %359  ;;  %v385_v49 = vpop.permute.xlu2 %384 }
 0x198   :  { %v429_v4 = vsub.f32 %v1134_v56, %v360_v54  ;;  %v380_v57 = vpop.permute.xlu1 %379  ;;  %v434_v53 = vsub.f32 %v1156_v63, %v385_v49  ;;  %v564_v63 = vmul.f32 %v1050_v23, %v1050_v23  ;;  %v587_v54 = vsel %vm89_vm0, %v563_v51, 0.0 }
 0x199   :  { %v433_v44 = vsub.f32 %v1143_v59, %v380_v57  ;;  %v567_v23 = vmul.f32 %v1020_v10, %v1020_v10  ;;  %v572_v10 = vmul.f32 %v1038_v21, %v1038_v21  ;;  %v1529_v49 = vsub.f32 %v1197_v6, %v1202_v12 }
 0x19a   :  { %v853_v25 = vpop.eup %852  ;;  %v447_v55 = vmul.f32 1.442695, %v429_v4  ;;  %v457_v34 = vmul.f32 1.442695, %v434_v53  ;;  %v590_v57 = vsel %vm89_vm0, %v564_v63, 0.0  ;;  %v1532_v6 = vsub.f32 %v1220_v20, %v1232_v27 }
 0x19b   :  { %v855_v16 = vpop.eup %854  ;;  %493 = vadd.xlane.f32.xlu0 %v853_v25  ;;  %v455_v8 = vmul.f32 1.442695, %v433_v44  ;;  %v599_v48 = vsel %vm89_vm0, %v567_v23, 0.0  ;;  %v570_v44 = vmul.f32 %v1095_v38, %v1095_v38  ;;  %v571_v38 = vmul.f32 %v1007_v7, %v1007_v7 }
 0x19c   :  { %v857_v17 = vpop.eup %856  ;;  %858 = vpow2.f32 %v447_v55  ;;  %485 = vadd.xlane.f32.xlu2 %v855_v16  ;;  %v569_v55 = vmul.f32 %v1075_v31, %v1075_v31  ;;  %v565_v16 = vmul.f32 %v1070_v30, %v1070_v30  ;;  %v568_v31 = vmul.f32 %v1045_v22, %v1045_v22 }
 0x19d   :  { %860 = vpow2.f32 %v449_v5  ;;  %495 = vadd.xlane.f32.xlu1 %v857_v17  ;;  %v608_v30 = vsel %vm89_vm0, %v570_v44, 0.0  ;;  %v574_v22 = vmul.f32 %v1085_v36, %v1085_v36  ;;  %v1530_v7 = vsub.f32 %v1218_v18, %v1223_v24  ;;  %v272_v44 = vld [vmem:[#allocation3 + $0x28] sm:$0xff] }
 0x19e   :  { %862 = vpow2.f32 %v469_v61  ;;  %v605_v39 = vsel %vm89_vm0, %v569_v55, 0.0  ;;  %v593_v17 = vsel %vm89_vm0, %v565_v16, 0.0  ;;  %v614_v61 = vsel %vm89_vm0, %v572_v10, 0.0 }
 0x19f   :  { %864 = vpow2.f32 %v455_v8  ;;  %v425_v32 = vpop.permute.xlu0 %424  ;;  %v602_v8 = vsel %vm89_vm0, %v568_v31, 0.0  ;;  %v315_v12 = vmul.f32 1.442695, %v1532_v6  ;;  %v1533_v18 = vsub.f32 %v1240_v33, %v1248_v41  ;;  %v277_v31 = vld [vmem:[#allocation3 + $0x50] sm:$0xff] }
 0x1a0   :  { %v420_v50 = vpop.permute.xlu1 %419  ;;  %v1534_v20 = vsub.f32 %v1269_v0, %v1277_v19  ;;  %v1535_v33 = vsub.f32 %v1245_v40, %v1261_v45  ;;  %v268_v0 = vld [vmem:[#allocation3 + $0x8] sm:$0xff]  ;;  %v1537_v45 = vsub.f32 %v1263_v46, %v1272_v2 }
 0x1a1   :  { %v441_v56 = vsub.f32 %v1140_v58, %v420_v50  ;;  %v442_v58 = vsub.f32 %v1152_v62, %v425_v32  ;;  %v573_v50 = vmul.f32 %v1060_v28, %v1060_v28  ;;  %v323_v28 = vmul.f32 1.442695, %v1530_v7  ;;  %v1539_v2 = vld [vmem:[#allocation11_spill] sm:$0xff]  ;;  %v1546_v7 = vld [vmem:[#allocation17_spill] sm:$0xff] }
 0x1a2   :  { %v859_v26 = vpop.eup %858  ;;  %v301_v24 = vmul.f32 1.442695, %v1533_v18  ;;  %v317_v27 = vmul.f32 1.442695, %v1534_v20  ;;  %v309_v41 = vmul.f32 1.442695, %v1535_v33 }
 0x1a3   :  { %v861_v3 = vpop.eup %860  ;;  %v471_v52 = vmul.f32 1.442695, %v441_v56  ;;  %479 = vadd.xlane.f32.xlu0 %v859_v26  ;;  %v473_v43 = vmul.f32 1.442695, %v442_v58  ;;  %v617_v21 = vsel %vm89_vm0, %v573_v50, 0.0  ;;  %v611_v56 = vsel %vm89_vm0, %v571_v38, 0.0 }
 0x1a4   :  { %481 = vadd.xlane.f32.xlu2 %v861_v3  ;;  %v863_v59 = vpop.eup %862  ;;  %v620_v26 = vsel %vm89_vm0, %v574_v22, 0.0  ;;  %v299_v3 = vmul.f32 1.442695, %v1529_v49  ;;  %v1542_v50 = vld [vmem:[#allocation13_spill] sm:$0xff]  ;;  %v1543_v38 = vld [vmem:[#allocation14_spill] sm:$0xff] }
 0x1a5   :  { %866 = vpow2.f32 %v471_v52  ;;  %v865_v35 = vpop.eup %864  ;;  %v1531_v52 = vsub.f32 %v1199_v11, %v1210_v15  ;;  %v279_v11 = vld [vmem:[#allocation3 + $0x60] sm:$0xff] }
 0x1a6   :  { %868 = vpow2.f32 %v457_v34  ;;  %v267_v34 = vld [vmem:[#allocation3] sm:$0xff] }
 0x1a7   :  { %870 = vpow2.f32 %v473_v43  ;;  %v307_v53 = vmul.f32 1.442695, %v1531_v52  ;;  %v1549_v20 = vld [vmem:[#allocation22_spill] sm:$0xff] }
 0x1a8   :  { %v405_v42 = vpop.permute.xlu1 %404 }
 0x1a9   :  { %v438_v29 = vsub.f32 %v1146_v60, %v405_v42  ;;  %v596_v60 = vsel %vm89_vm0, %v566_v9, 0.0  ;;  %v275_v9 = vld [vmem:[#allocation3 + $0x40] sm:$0xff] }
 0x1ab   :  { %v867_v13 = vpop.eup %866  ;;  %487 = vadd.xlane.f32.xlu0 %v865_v35  ;;  %v465_v4 = vmul.f32 1.442695, %v438_v29 }
 0x1ac   :  { %501 = vadd.xlane.f32.xlu2 %v863_v59  ;;  %503 = vadd.xlane.f32.xlu1 %v867_v13  ;;  %v869_v5 = vpop.eup %868  ;;  %v271_v13 = vld [vmem:[#allocation3 + $0x20] sm:$0xff] }
 0x1ad   :  { %872 = vpow2.f32 %v465_v4  ;;  %v871_v62 = vpop.eup %870  ;;  %v1536_v4 = vsub.f32 %v1292_v1, %v1301_v47  ;;  %v1538_v47 = vsub.f32 %v1322_v37, %v1331_v14 }
 0x1ae   :  { %874 = vpow2.f32 %v299_v3  ;;  %v1545_v3 = vld [vmem:[#allocation15_spill] sm:$0xff] }
 0x1af   :  { %876 = vpow2.f32 %v323_v28  ;;  %v305_v1 = vmul.f32 1.442695, %v1538_v47  ;;  %v1547_v28 = vsub.f32 %v1545_v3, %v1546_v7 }
 0x1b0   :  { %878 = vpow2.f32 %v307_v53 }
 0x1b1   :  { %880 = vpow2.f32 %v315_v12  ;;  %v311_v52 = vmul.f32 1.442695, %v1547_v28  ;;  %v270_v12 = vld [vmem:[#allocation3 + $0x18] sm:$0xff] }
 0x1b2   :  { %882 = vpow2.f32 %v301_v24 }
 0x1b3   :  { %588 = vadd.xlane.f32.xlu0 %v587_v54  ;;  %v873_v25 = vpop.eup %872  ;;  %884 = vpow2.f32 %v317_v27 }
 0x1b4   :  { %591 = vadd.xlane.f32.xlu2 %v590_v57  ;;  %489 = vadd.xlane.f32.xlu1 %v869_v5  ;;  %v875_v59 = vpop.eup %874  ;;  %v319_v57 = vmul.f32 1.442695, %v1536_v4  ;;  %886 = vpow2.f32 %v309_v41  ;;  %v273_v41 = vld [vmem:[#allocation3 + $0x30] sm:$0xff]  ;;  %v280_v4 = vld [vmem:[#allocation3 + $0x68] sm:$0xff] }
 0x1b5   :  { %v331_v36 = vmul.f32 %v875_v59, %v267_v34  ;;  %v877_v42 = vpop.eup %876 }
 0x1b6   :  { %v879_v15 = vpop.eup %878  ;;  %v343_v58 = vmul.f32 %v877_v42, %v279_v11  ;;  %888 = vpow2.f32 %v319_v57  ;;  %v281_v57 = vld [vmem:[#allocation3 + $0x70] sm:$0xff] }
 0x1b7   :  { %v335_v63 = vmul.f32 %v879_v15, %v271_v13  ;;  %v881_v5 = vpop.eup %880 }
 0x1b8   :  { %v339_v19 = vmul.f32 %v881_v5, %v275_v9 }
 0x1bb   :  { %505 = vadd.xlane.f32.xlu0 %v871_v62 }
 0x1bc   :  { %597 = vadd.xlane.f32.xlu2 %v596_v60  ;;  %497 = vadd.xlane.f32.xlu1 %v873_v25  ;;  %v883_v60 = vpop.eup %882  ;;  %v303_v25 = vmul.f32 1.442695, %v1537_v45 }
 0x1bd   :  { %v332_v40 = vmul.f32 %v883_v60, %v268_v0 }
 0x1be   :  { %890 = vpow2.f32 %v303_v25 }
 0x1bf   :  { %892 = vpow2.f32 %v305_v1 }
 0x1c3   :  { %600 = vadd.xlane.f32.xlu0 %v599_v48  ;;  %v885_v48 = vpop.eup %884 }
 0x1c4   :  { %606 = vadd.xlane.f32.xlu2 %v605_v39  ;;  %594 = vadd.xlane.f32.xlu1 %v593_v17  ;;  %v276_v39 = vld [vmem:[#allocation3 + $0x48] sm:$0xff]  ;;  %v887_v17 = vpop.eup %886 }
 0x1c5   :  { %v889_v10 = vpop.eup %888  ;;  %v340_v46 = vmul.f32 %v885_v48, %v276_v39  ;;  %v336_v37 = vmul.f32 %v887_v17, %v272_v44 }
 0x1c6   :  { %v341_v49 = vmul.f32 %v889_v10, %v277_v31  ;;  %v1554_v10 = vld [vmem:[#allocation16_spill] sm:$0xff]  ;;  %v1555_v31 = vld [vmem:[#allocation18_spill] sm:$0xff] }
 0x1cb   :  { %609 = vadd.xlane.f32.xlu0 %v608_v30  ;;  %v1540_v30 = vld [vmem:[#allocation12_spill] sm:$0xff] }
 0x1cc   :  { %615 = vadd.xlane.f32.xlu2 %v614_v61  ;;  %603 = vadd.xlane.f32.xlu1 %v602_v8  ;;  %v1541_v61 = vsub.f32 %v1539_v2, %v1540_v30 }
 0x1ce   :  { %v325_v8 = vmul.f32 1.442695, %v1541_v61  ;;  %v688_v61 = vld [vmem:[#allocation2 + $0x8] sm:$0xff] }
 0x1d0   :  { %894 = vpow2.f32 %v325_v8 }
 0x1d3   :  { %618 = vadd.xlane.f32.xlu0 %v617_v21  ;;  %v1544_v21 = vsub.f32 %v1542_v50, %v1543_v38  ;;  %v274_v50 = vld [vmem:[#allocation3 + $0x38] sm:$0xff]  ;;  %v1557_v38 = vld [vmem:[#allocation8_spill] sm:$0xff] }
 0x1d4   :  { %612 = vadd.xlane.f32.xlu1 %v611_v56 }
 0x1d5   :  { %v327_v56 = vmul.f32 1.442695, %v1544_v21  ;;  %v624_v21 = vmul.f32 2.0, %v1557_v38 }
 0x1d7   :  { %896 = vpow2.f32 %v327_v56 }
 0x1d8   :  { %898 = vpow2.f32 %v311_v52 }
 0x1dc   :  { %621 = vadd.xlane.f32.xlu1 %v620_v26 }
 0x1f6   :  { %v476_v32 = vpop.xlane.xlu2 %475 }
 0x1f7   :  { %v507_v35 = vadd.f32 %v476_v32, %v331_v36  ;;  %v891_v36 = vpop.eup %890  ;;  %v269_v32 = vld [vmem:[#allocation3 + $0x10] sm:$0xff] }
 0x1f8   :  { %v893_v6 = vpop.eup %892  ;;  %v333_v18 = vmul.f32 %v891_v36, %v269_v32 }
 0x1f9   :  { %524 = vst.msk [vmem:[#allocation3] sm:$0xff] %vm16_vm1, %v507_v35  ;;  %v334_v11 = vmul.f32 %v893_v6, %v270_v12 }
 0x1fe   :  { %v500_v51 = vpop.xlane.xlu0 %499 }
 0x1ff   :  { %v519_v29 = vadd.f32 %v500_v51, %v343_v58  ;;  %v484_v43 = vpop.xlane.xlu1 %483  ;;  %v895_v58 = vpop.eup %894 }
 0x200   :  { %v511_v54 = vadd.f32 %v484_v43, %v335_v63  ;;  %v639_v42 = vld [vmem:[#allocation3] sm:$0xff]  ;;  %v1548_v63 = vld [vmem:[#allocation21_spill] sm:$0xff]  ;;  %v344_v60 = vmul.f32 %v895_v58, %v280_v4 }
 0x201   :  { %536 = vst.msk [vmem:[#allocation3 + $0x60] sm:$0xff] %vm16_vm1, %v519_v29  ;;  %v897_v29 = vpop.eup %896  ;;  %v1550_v27 = vsub.f32 %v1548_v63, %v1549_v20  ;;  %v1560_v20 = vld [vmem:[#allocation10_spill] sm:$0xff] }
 0x202   :  { %528 = vst.msk [vmem:[#allocation3 + $0x20] sm:$0xff] %vm16_vm1, %v511_v54  ;;  %v899_v33 = vpop.eup %898 }
 0x203   :  { %v313_v43 = vmul.f32 1.442695, %v1550_v27  ;;  %v337_v9 = vmul.f32 %v899_v33, %v273_v41  ;;  %v626_v27 = vmul.f32 2.0, %v1560_v20  ;;  %v278_v33 = vld [vmem:[#allocation3 + $0x58] sm:$0xff] }
 0x207   :  { %v492_v62 = vpop.xlane.xlu2 %491 }
 0x208   :  { %v515_v23 = vadd.f32 %v492_v62, %v339_v19  ;;  %v478_v55 = vpop.xlane.xlu1 %477  ;;  %v345_v19 = vmul.f32 %v897_v29, %v281_v57  ;;  %v282_v29 = vld [vmem:[#allocation3 + $0x78] sm:$0xff] }
 0x209   :  { %v508_v16 = vadd.f32 %v478_v55, %v332_v40  ;;  %v1552_v55 = vld [vmem:[#allocation20_spill] sm:$0xff]  ;;  %v643_v17 = vld [vmem:[#allocation3 + $0x20] sm:$0xff] }
 0x20a   :  { %532 = vst.msk [vmem:[#allocation3 + $0x40] sm:$0xff] %vm16_vm1, %v515_v23  ;;  %v1551_v23 = vld [vmem:[#allocation19_spill] sm:$0xff] }
 0x20b   :  { %525 = vst.msk [vmem:[#allocation3 + $0x8] sm:$0xff] %vm16_vm1, %v508_v16  ;;  %v1553_v47 = vsub.f32 %v1551_v23, %v1552_v55  ;;  %v691_v23 = vld [vmem:[#allocation2 + $0x20] sm:$0xff] }
 0x20d   :  { %v329_v1 = vmul.f32 1.442695, %v1553_v47 }
 0x20e   :  { %v494_v14 = vpop.xlane.xlu0 %493 }
 0x20f   :  { %v516_v22 = vadd.f32 %v494_v14, %v340_v46  ;;  %v486_v26 = vpop.xlane.xlu2 %485  ;;  %v1556_v46 = vsub.f32 %v1554_v10, %v1555_v31 }
 0x210   :  { %v512_v53 = vadd.f32 %v486_v26, %v336_v37  ;;  %v496_v59 = vpop.xlane.xlu1 %495  ;;  %v687_v37 = vld [vmem:[#allocation2] sm:$0xff]  ;;  %v1558_v26 = vld [vmem:[#allocation7_spill] sm:$0xff] }
 0x211   :  { %533 = vst.msk [vmem:[#allocation3 + $0x48] sm:$0xff] %vm16_vm1, %v516_v22  ;;  %v517_v34 = vadd.f32 %v496_v59, %v341_v49  ;;  %v321_v2 = vmul.f32 1.442695, %v1556_v46  ;;  %v623_v49 = vmul.f32 2.0, %v1558_v26  ;;  %v647_v41 = vld [vmem:[#allocation3 + $0x40] sm:$0xff] }
 0x212   :  { %529 = vst.msk [vmem:[#allocation3 + $0x28] sm:$0xff] %vm16_vm1, %v512_v53  ;;  %v640_v35 = vld [vmem:[#allocation3 + $0x8] sm:$0xff] }
 0x213   :  { %534 = vst.msk [vmem:[#allocation3 + $0x50] sm:$0xff] %vm16_vm1, %v517_v34  ;;  %900 = vlog2.f32 %v640_v35 }
 0x214   :  { %902 = vlog2.f32 %v639_v42 }
 0x215   :  { %904 = vpow2.f32 %v313_v43 }
 0x216   :  { %v480_v24 = vpop.xlane.xlu0 %479 }
 0x217   :  { %v509_v15 = vadd.f32 %v480_v24, %v333_v18  ;;  %v482_v13 = vpop.xlane.xlu2 %481  ;;  %v689_v18 = vld [vmem:[#allocation2 + $0x10] sm:$0xff] }
 0x218   :  { %v510_v51 = vadd.f32 %v482_v13, %v334_v11  ;;  %v1559_v11 = vld [vmem:[#allocation9_spill] sm:$0xff] }
 0x219   :  { %526 = vst.msk [vmem:[#allocation3 + $0x10] sm:$0xff] %vm16_vm1, %v509_v15  ;;  %v901_v54 = vpop.eup %900  ;;  %v644_v56 = vld [vmem:[#allocation3 + $0x28] sm:$0xff]  ;;  %v625_v15 = vmul.f32 2.0, %v1559_v11  ;;  %v690_v13 = vld [vmem:[#allocation2 + $0x18] sm:$0xff]  ;;  %v695_v11 = vld [vmem:[#allocation2 + $0x40] sm:$0xff] }
 0x21a   :  { %527 = vst.msk [vmem:[#allocation3 + $0x18] sm:$0xff] %vm16_vm1, %v510_v51  ;;  %v903_v5 = vpop.eup %902  ;;  %v658_v62 = vmul.f32 0.6931472, %v901_v54  ;;  %v649_v10 = vld [vmem:[#allocation3 + $0x50] sm:$0xff] }
 0x21b   :  { %v656_v44 = vmul.f32 0.6931472, %v903_v5  ;;  %v905_v14 = vpop.eup %904 }
 0x21c   :  { %v704_v8 = vadd.f32 %v688_v61, %v658_v62  ;;  %v338_v28 = vmul.f32 %v905_v14, %v274_v50 }
 0x21d   :  { %v703_v22 = vadd.f32 %v687_v37, %v656_v44 }
 0x21e   :  { %v488_v0 = vpop.xlane.xlu0 %487  ;;  %v720_v7 = vsub.f32 %v704_v8, %v624_v21  ;;  %v692_v8 = vld [vmem:[#allocation2 + $0x28] sm:$0xff] }
 0x21f   :  { %v502_v40 = vpop.xlane.xlu2 %501  ;;  %v513_v45 = vadd.f32 %v488_v0, %v337_v9  ;;  %v504_v25 = vpop.xlane.xlu1 %503  ;;  %v719_v32 = vsub.f32 %v703_v22, %v623_v49  ;;  %v651_v22 = vld [vmem:[#allocation3 + $0x60] sm:$0xff] }
 0x220   :  { %v520_v16 = vadd.f32 %v502_v40, %v344_v60  ;;  %v521_v48 = vadd.f32 %v504_v25, %v345_v19  ;;  %v641_v39 = vld [vmem:[#allocation3 + $0x10] sm:$0xff]  ;;  %v736_v51 = vsel %vm16_vm1, %v720_v7, 0.0  ;;  %v648_v25 = vld [vmem:[#allocation3 + $0x48] sm:$0xff] }
 0x221   :  { %530 = vst.msk [vmem:[#allocation3 + $0x30] sm:$0xff] %vm16_vm1, %v513_v45  ;;  %v642_v30 = vld [vmem:[#allocation3 + $0x18] sm:$0xff]  ;;  %906 = vlog2.f32 %v641_v39  ;;  %v735_v57 = vsel %vm16_vm1, %v719_v32, 0.0  ;;  %v693_v7 = vld [vmem:[#allocation2 + $0x30] sm:$0xff] }
 0x222   :  { %537 = vst.msk [vmem:[#allocation3 + $0x68] sm:$0xff] %vm16_vm1, %v520_v16  ;;  %908 = vlog2.f32 %v642_v30  ;;  %v737_v60 = vadd.f32 %v736_v51, %v735_v57 }
 0x223   :  { %538 = vst.msk [vmem:[#allocation3 + $0x70] sm:$0xff] %vm16_vm1, %v521_v48  ;;  %910 = vlog2.f32 %v643_v17 }
 0x224   :  { %912 = vpow2.f32 %v329_v1 }
 0x225   :  { %914 = vpow2.f32 %v321_v2 }
 0x226   :  { %v589_v3 = vpop.xlane.xlu0 %588  ;;  %916 = vlog2.f32 %v644_v56 }
 0x227   :  { %v907_v52 = vpop.eup %906  ;;  %v592_v53 = vpop.xlane.xlu2 %591  ;;  %v627_v62 = vmul.f32 2.0, %v589_v3 }
 0x228   :  { %v490_v59 = vpop.xlane.xlu1 %489  ;;  %v909_v34 = vpop.eup %908  ;;  %v660_v36 = vmul.f32 0.6931472, %v907_v52  ;;  %v645_v6 = vld [vmem:[#allocation3 + $0x30] sm:$0xff]  ;;  %v628_v30 = vmul.f32 2.0, %v592_v53 }
 0x229   :  { %v514_v35 = vadd.f32 %v490_v59, %v338_v28  ;;  %v911_v12 = vpop.eup %910  ;;  %v662_v42 = vmul.f32 0.6931472, %v909_v34  ;;  %918 = vlog2.f32 %v645_v6  ;;  %v652_v34 = vld [vmem:[#allocation3 + $0x68] sm:$0xff] }
 0x22a   :  { %v913_v24 = vpop.eup %912  ;;  %v705_v58 = vadd.f32 %v689_v18, %v660_v36  ;;  %v664_v4 = vmul.f32 0.6931472, %v911_v12  ;;  %920 = vlog2.f32 %v647_v41 }
 0x22b   :  { %531 = vst.msk [vmem:[#allocation3 + $0x38] sm:$0xff] %vm16_vm1, %v514_v35  ;;  %v915_v63 = vpop.eup %914  ;;  %v706_v43 = vadd.f32 %v690_v13, %v662_v42  ;;  %v346_v0 = vmul.f32 %v913_v24, %v282_v29  ;;  %922 = vlog2.f32 %v648_v25  ;;  %v694_v24 = vld [vmem:[#allocation2 + $0x38] sm:$0xff] }
 0x22c   :  { %v721_v54 = vsub.f32 %v705_v58, %v625_v15  ;;  %v917_v5 = vpop.eup %916  ;;  %v342_v45 = vmul.f32 %v915_v63, %v278_v33  ;;  %v707_v17 = vadd.f32 %v691_v23, %v664_v4 }
 0x22d   :  { %v722_v9 = vsub.f32 %v706_v43, %v626_v27  ;;  %v666_v48 = vmul.f32 0.6931472, %v917_v5  ;;  %v653_v27 = vld [vmem:[#allocation3 + $0x70] sm:$0xff] }
 0x22e   :  { %v738_v19 = vsel %vm16_vm1, %v721_v54, 0.0  ;;  %v506_v40 = vpop.xlane.xlu0 %505  ;;  %v723_v61 = vsub.f32 %v707_v17, %v627_v62 }
 0x22f   :  { %v739_v55 = vadd.f32 %v738_v19, %v737_v60  ;;  %v598_v47 = vpop.xlane.xlu2 %597  ;;  %v522_v1 = vadd.f32 %v506_v40, %v346_v0  ;;  %v740_v39 = vsel %vm16_vm1, %v722_v9, 0.0  ;;  %v919_v31 = vpop.eup %918  ;;  %v708_v37 = vadd.f32 %v692_v8, %v666_v48  ;;  %v697_v9 = vld [vmem:[#allocation2 + $0x50] sm:$0xff]  ;;  %v696_v60 = vld [vmem:[#allocation2 + $0x48] sm:$0xff] }
 0x230   :  { %v498_v16 = vpop.xlane.xlu1 %497  ;;  %v921_v14 = vpop.eup %920  ;;  %v668_v50 = vmul.f32 0.6931472, %v919_v31  ;;  %v742_v21 = vsel %vm16_vm1, %v723_v61, 0.0  ;;  %v630_v32 = vmul.f32 2.0, %v598_v47 }
 0x231   :  { %v518_v44 = vadd.f32 %v498_v16, %v342_v45  ;;  %v741_v46 = vadd.f32 %v740_v39, %v739_v55  ;;  %539 = vst.msk [vmem:[#allocation3 + $0x78] sm:$0xff] %vm16_vm1, %v522_v1  ;;  %v724_v38 = vsub.f32 %v708_v37, %v628_v30  ;;  %v923_v26 = vpop.eup %922  ;;  %v672_v3 = vmul.f32 0.6931472, %v921_v14  ;;  %v698_v39 = vld [vmem:[#allocation2 + $0x58] sm:$0xff] }
 0x232   :  { %v646_v2 = vld [vmem:[#allocation3 + $0x38] sm:$0xff]  ;;  %v709_v53 = vadd.f32 %v693_v7, %v668_v50  ;;  %v674_v20 = vmul.f32 0.6931472, %v923_v26 }
 0x233   :  { %924 = vlog2.f32 %v646_v2  ;;  %535 = vst.msk [vmem:[#allocation3 + $0x58] sm:$0xff] %vm16_vm1, %v518_v44  ;;  %v743_v49 = vadd.f32 %v742_v21, %v741_v46  ;;  %v744_v18 = vsel %vm16_vm1, %v724_v38, 0.0  ;;  %v711_v58 = vadd.f32 %v695_v11, %v672_v3  ;;  %v699_v38 = vld [vmem:[#allocation2 + $0x60] sm:$0xff]  ;;  %v700_v21 = vld [vmem:[#allocation2 + $0x68] sm:$0xff] }
 0x234   :  { %926 = vlog2.f32 %v649_v10  ;;  %v712_v45 = vadd.f32 %v696_v60, %v674_v20 }
 0x235   :  { %928 = vlog2.f32 %v651_v22  ;;  %v745_v51 = vadd.f32 %v744_v18, %v743_v49 }
 0x236   :  { %v601_v56 = vpop.xlane.xlu0 %600 }
 0x237   :  { %v607_v6 = vpop.xlane.xlu2 %606  ;;  %v631_v12 = vmul.f32 2.0, %v601_v56 }
 0x238   :  { %v595_v28 = vpop.xlane.xlu1 %594  ;;  %v633_v54 = vmul.f32 2.0, %v607_v6  ;;  %v654_v23 = vld [vmem:[#allocation3 + $0x78] sm:$0xff] }
 0x239   :  { %v925_v52 = vpop.eup %924  ;;  %v629_v59 = vmul.f32 2.0, %v595_v28  ;;  %v727_v33 = vsub.f32 %v711_v58, %v631_v12 }
 0x23a   :  { %v927_v36 = vpop.eup %926  ;;  %v670_v35 = vmul.f32 0.6931472, %v925_v52  ;;  %v650_v42 = vld [vmem:[#allocation3 + $0x58] sm:$0xff] }
 0x23b   :  { %v725_v15 = vsub.f32 %v709_v53, %v629_v59  ;;  %930 = vlog2.f32 %v650_v42  ;;  %v676_v29 = vmul.f32 0.6931472, %v927_v36  ;;  %v929_v57 = vpop.eup %928  ;;  %v750_v47 = vsel %vm16_vm1, %v727_v33, 0.0 }
 0x23c   :  { %v710_v13 = vadd.f32 %v694_v24, %v670_v35  ;;  %932 = vlog2.f32 %v652_v34  ;;  %v680_v46 = vmul.f32 0.6931472, %v929_v57 }
 0x23d   :  { %v746_v63 = vsel %vm16_vm1, %v725_v15, 0.0  ;;  %934 = vlog2.f32 %v653_v27  ;;  %v713_v62 = vadd.f32 %v697_v9, %v676_v29  ;;  %v702_v15 = vld [vmem:[#allocation2 + $0x78] sm:$0xff] }
 0x23e   :  { %v726_v43 = vsub.f32 %v710_v13, %v630_v32  ;;  %v747_v41 = vadd.f32 %v746_v63, %v745_v51  ;;  %v610_v4 = vpop.xlane.xlu0 %609  ;;  %936 = vlog2.f32 %v654_v23  ;;  %v715_v26 = vadd.f32 %v699_v38, %v680_v46  ;;  %v701_v32 = vld [vmem:[#allocation2 + $0x70] sm:$0xff] }
 0x23f   :  { %v634_v1 = vmul.f32 2.0, %v610_v4  ;;  %v729_v48 = vsub.f32 %v713_v62, %v633_v54  ;;  %v616_v10 = vpop.xlane.xlu2 %615 }
 0x240   :  { %v748_v5 = vsel %vm16_vm1, %v726_v43, 0.0  ;;  %v604_v0 = vpop.xlane.xlu1 %603  ;;  %v636_v50 = vmul.f32 2.0, %v616_v10 }
 0x241   :  { %v931_v19 = vpop.eup %930  ;;  %v749_v40 = vadd.f32 %v748_v5, %v747_v41  ;;  %v632_v25 = vmul.f32 2.0, %v604_v0  ;;  %v754_v37 = vsel %vm16_vm1, %v729_v48, 0.0 }
 0x242   :  { %v933_v55 = vpop.eup %932  ;;  %v678_v16 = vmul.f32 0.6931472, %v931_v19 }
 0x243   :  { %v728_v17 = vsub.f32 %v712_v45, %v632_v25  ;;  %v751_v44 = vadd.f32 %v750_v47, %v749_v40  ;;  %v682_v2 = vmul.f32 0.6931472, %v933_v55  ;;  %v935_v61 = vpop.eup %934 }
 0x244   :  { %v714_v31 = vadd.f32 %v698_v39, %v678_v16  ;;  %v684_v28 = vmul.f32 0.6931472, %v935_v61  ;;  %v937_v53 = vpop.eup %936 }
 0x245   :  { %v752_v30 = vsel %vm16_vm1, %v728_v17, 0.0  ;;  %v716_v3 = vadd.f32 %v700_v21, %v682_v2  ;;  %v686_v42 = vmul.f32 0.6931472, %v937_v53 }
 0x246   :  { %v730_v8 = vsub.f32 %v714_v31, %v634_v1  ;;  %v753_v14 = vadd.f32 %v752_v30, %v751_v44  ;;  %v619_v22 = vpop.xlane.xlu0 %618  ;;  %v717_v6 = vadd.f32 %v701_v32, %v684_v28 }
 0x247   :  { %v732_v59 = vsub.f32 %v716_v3, %v636_v50  ;;  %v637_v34 = vmul.f32 2.0, %v619_v22  ;;  %v718_v51 = vadd.f32 %v702_v15, %v686_v42 }
 0x248   :  { %v755_v56 = vadd.f32 %v754_v37, %v753_v14  ;;  %v613_v49 = vpop.xlane.xlu1 %612  ;;  %v756_v7 = vsel %vm16_vm1, %v730_v8, 0.0 }
 0x249   :  { %v635_v52 = vmul.f32 2.0, %v613_v49  ;;  %v760_v24 = vsel %vm16_vm1, %v732_v59, 0.0  ;;  %v733_v11 = vsub.f32 %v717_v6, %v637_v34 }
 0x24a   :  { %v757_v35 = vadd.f32 %v756_v7, %v755_v56 }
 0x24b   :  { %v731_v36 = vsub.f32 %v715_v26, %v635_v52  ;;  %v762_v63 = vsel %vm16_vm1, %v733_v11, 0.0 }
 0x24d   :  { %v758_v12 = vsel %vm16_vm1, %v731_v36, 0.0 }
 0x24e   :  { %v759_v18 = vadd.f32 %v758_v12, %v757_v35 }
 0x250   :  { %v622_v13 = vpop.xlane.xlu1 %621  ;;  %v761_v58 = vadd.f32 %v760_v24, %v759_v18 }
 0x251   :  { %v638_v29 = vmul.f32 2.0, %v622_v13 }
 0x252   :  { %v763_v27 = vadd.f32 %v762_v63, %v761_v58 }
 0x253   :  { %v734_v20 = vsub.f32 %v718_v51, %v638_v29 }
 0x255   :  { %v764_v43 = vsel %vm16_vm1, %v734_v20, 0.0 }
 0x256   :  { %v765_v33 = vadd.f32 %v764_v43, %v763_v27 }
 0x258   :  { %766 = vadd.xlane.f32.xlu2 %v765_v33 }
 0x2cb   :  { %v767_v41 = vpop.xlane.xlu2 %766 }
 0x2cc   :  { %v768_v54 = vrot.slane %v767_v41, 4 }
 0x2ce   :  { %v769_v4 = vadd.f32 %v768_v54, %v767_v41 }
 0x2d0   :  { %v770_v57 = vrot.slane %v769_v4, 2 }
 0x2d2   :  { %v771_v5 = vadd.f32 %v770_v57, %v769_v4 }
 0x2d4   :  { %v772_v9 = vrot.slane %v771_v5, 1 }
 0x2d6   :  { %v773_v60 = vadd.f32 %v772_v9, %v771_v5 }
 0x2d8   :  { %833 = vpush %v773_v60 }
 0x309   :  { %s834_s4 = spop %833 }
 0x30a   :  { %v775_v0 = vstv %s834_s4 }
 0x30b   :  { %776 = vst [vmem:[#allocation4] sm:$0xff] %v775_v0 }
 0x30c   :  { %787 = dma.vmem_to_hbm [thread:$0]  %s783_s28, 128, %s785_s3, [#allocation5]  }
 0x30d   :  { %962 = dma.done.wait [#allocation5], 128  }
 0x30e   :  { %963 = vsyncadd [#allocation5], 4294967168 }
 0x30f   :  { %792 = vsyncpa [#allocation5], 1 }

</bundles_post_ra>
